<compile_context>
chip_gen: v7x
topology: tpu7x:2x2x1
jax: 0.10.0
libtpu: 0.0.40
codegen_flags: <defaults>
</compile_context>

<pallas_src>
import math
from functools import partial

import jax
import jax.numpy as jnp
from jax.experimental import pallas as pl
from jax.experimental.pallas import tpu as pltpu

_LN_EPS = 1e-5  # PyTorch nn.LayerNorm default

# Rows of the packed (NVEC, H) vector slab.
_BIP, _BIV, _BIQ, _BTK, _BTV = 0, 1, 2, 3, 4
_GIN, _BIN, _GTN, _BTN = 5, 6, 7, 8
_BF, _GF, _BFN = 9, 10, 11
_WGD_T, _WGD_I, _BGD = 12, 13, 14
_NVEC = 15

# Slices of the packed (6, H, H) weight stack.
_WIV, _WIQ, _WTK, _WTV, _WF_T, _WF_I = 0, 1, 2, 3, 4, 5

_NT_DIMS = (((1,), (1,)), ((), ()))  # A @ B.T contraction for dot_general


def _layernorm(x, gamma, beta):
    mu = jnp.mean(x, axis=-1, keepdims=True)
    var = jnp.mean((x - mu) ** 2, axis=-1, keepdims=True)
    return (x - mu) * jax.lax.rsqrt(var + _LN_EPS) * gamma + beta


def _gelu_exact(x):
    # nn.GELU() default is the exact erf formulation.
    return 0.5 * x * (1.0 + jax.lax.erf(x * (1.0 / math.sqrt(2.0))))


def fusion_kernel(text_ref, img_ref, wip_ref, wstack_ref, vecs_ref, out_ref, *, B, S):
    H = out_ref.shape[-1]
    scale = 1.0 / math.sqrt(H)

    text_flat = text_ref[...].astype(jnp.float32)      # (B*S, H)
    imgf = img_ref[...].astype(jnp.float32)            # (B, IMG_DIM)
    vecs = vecs_ref[...]                                # (NVEC, H)

    def vrow(i):                                        # (1, H) static slice
        return vecs[i:i + 1, :]

    # cls tokens: row b*S of the flattened text (static, sublane-aligned slices).
    cls = jnp.concatenate(
        [text_flat[b * S:b * S + 1, :] for b in range(B)], axis=0)  # (B, H)

    # ---- image projection ----
    img_proj = jnp.dot(imgf, wip_ref[...],
                       preferred_element_type=jnp.float32) + vrow(_BIP)      # (B, H)

    # ---- text (cls) side: softmax over a single image key is identically 1,
    #      so text_context == img_value(img_proj); text_query/img_key are dead.
    img_v = jnp.dot(img_proj, wstack_ref[_WIV],
                    preferred_element_type=jnp.float32) + vrow(_BIV)         # (B, H)
    text_ctx = _layernorm(img_v + cls, vrow(_GTN), vrow(_BTN))               # (B, H)

    # ---- image query attends over text tokens ----
    img_q = (jnp.dot(img_proj, wstack_ref[_WIQ],
                     preferred_element_type=jnp.float32) + vrow(_BIQ)) * scale  # (B, H)
    text_k = jnp.dot(text_flat, wstack_ref[_WTK],
                     preferred_element_type=jnp.float32) + vrow(_BTK)        # (B*S, H)
    text_v = jnp.dot(text_flat, wstack_ref[_WTV],
                     preferred_element_type=jnp.float32) + vrow(_BTV)        # (B*S, H)

    ctx_rows = []
    for b in range(B):                                   # B is small & static
        tk_b = text_k[b * S:(b + 1) * S, :]              # (S, H)
        tv_b = text_v[b * S:(b + 1) * S, :]              # (S, H)
        # scores = q @ K^T on the MXU (NT dot_general, no explicit transpose)
        s_b = jax.lax.dot_general(img_q[b:b + 1, :], tk_b, _NT_DIMS,
                                  preferred_element_type=jnp.float32)        # (1, S)
        m_b = jnp.max(s_b, axis=-1, keepdims=True)
        e_b = jnp.exp(s_b - m_b)
        a_b = e_b / jnp.sum(e_b, axis=-1, keepdims=True)
        ctx_rows.append(jnp.dot(a_b, tv_b,
                                preferred_element_type=jnp.float32))         # (1, H)
    img_ctx = jnp.concatenate(ctx_rows, axis=0)                              # (B, H)
    img_ctx = _layernorm(img_ctx + img_proj, vrow(_GIN), vrow(_BIN))

    # ---- gated fusion: 2-way softmax == sigmoid of the logit difference ----
    d = (jnp.sum(text_ctx * vrow(_WGD_T), axis=-1, keepdims=True)
         + jnp.sum(img_ctx * vrow(_WGD_I), axis=-1, keepdims=True)
         + vecs[_BGD:_BGD + 1, 0:1])                                         # (B, 1)
    g_text = 1.0 / (1.0 + jnp.exp(-d))
    g_img = 1.0 - g_text
    weighted_text = text_ctx * g_text
    weighted_img = img_ctx * g_img

    # fusion linear as two accumulating matmuls (no (B, 2H) lane concat)
    fused = (jnp.dot(weighted_text, wstack_ref[_WF_T],
                     preferred_element_type=jnp.float32)
             + jnp.dot(weighted_img, wstack_ref[_WF_I],
                       preferred_element_type=jnp.float32)
             + vrow(_BF))
    fused = _layernorm(fused, vrow(_GF), vrow(_BFN))
    out_ref[...] = _gelu_exact(fused).astype(out_ref.dtype)


def multimodal_fusion(text_features, image_features, packed_params):
    """packed_params = (wip, wstack, vecs) from pack_params()."""
    B, S, H = text_features.shape
    wip, wstack, vecs = packed_params
    text_flat = text_features.reshape(B * S, H)          # free in XLA (wrapper)
    vspec = pl.BlockSpec(memory_space=pltpu.MemorySpace.VMEM)
    return pl.pallas_call(
        partial(fusion_kernel, B=B, S=S),
        out_shape=jax.ShapeDtypeStruct((B, H), jnp.float32),
        in_specs=[vspec] * 5,
        out_specs=vspec,
    )(text_flat, image_features, wip, wstack, vecs)


def init_params(key, img_dim, hidden):
    """Deterministic synthetic init mirroring the PyTorch module. Linear
    weights stored as (in, out) so x @ W + b == torch's x @ W.T + b."""
    std = 0.02
    ks = jax.random.split(key, 9)
    H = hidden

    def w(k, din, dout):
        return jax.random.normal(k, (din, dout), jnp.float32) * std

    zeros = lambda d: jnp.zeros((d,), jnp.float32)
    ones = lambda d: jnp.ones((d,), jnp.float32)
    return dict(
        wip=w(ks[0], img_dim, H), bip=zeros(H),           # image_projection
        wtq=w(ks[1], H, H), btq=zeros(H),                 # text_query (dead in fwd)
        wik=w(ks[2], H, H), bik=zeros(H),                 # img_key   (dead in fwd)
        wiv=w(ks[3], H, H), biv=zeros(H),                 # img_value
        wiq=w(ks[4], H, H), biq=zeros(H),                 # img_query
        wtk=w(ks[5], H, H), btk=zeros(H),                 # text_key
        wtv=w(ks[6], H, H), btv=zeros(H),                 # text_value
        gtn=ones(H), btn=zeros(H),                        # text_norm
        gin=ones(H), bin=zeros(H),                        # img_norm
        wf=w(ks[7], 2 * H, H), bf=zeros(H),               # fusion[0] Linear
        gf=ones(H), bfn=zeros(H),                         # fusion[1] LayerNorm
        wg=w(ks[8], 2 * H, 2), bg=zeros(2),               # gate[0] Linear
    )


def pack_params(p, hidden):
    """Pack parameters into 3 arrays (done once, outside the kernel).
    wtq/btq/wik/bik are intentionally omitted: the single-key softmax they feed
    is identically 1, so they never influence the output."""
    H = hidden
    wstack = jnp.stack([p["wiv"], p["wiq"], p["wtk"], p["wtv"],
                        p["wf"][:H, :], p["wf"][H:, :]], axis=0)       # (6, H, H)
    wgd = p["wg"][:, 0] - p["wg"][:, 1]                                # (2H,)
    bgd = p["bg"][0] - p["bg"][1]
    bgd_row = jnp.zeros((H,), jnp.float32).at[0].set(bgd)
    vecs = jnp.stack([p["bip"], p["biv"], p["biq"], p["btk"], p["btv"],
                      p["gin"], p["bin"], p["gtn"], p["btn"],
                      p["bf"], p["gf"], p["bfn"],
                      wgd[:H], wgd[H:], bgd_row], axis=0)              # (15, H)
    return p["wip"], wstack, vecs


def reference_forward(text, img, p):
    """Pure-JAX mirror of the PyTorch forward (for correctness check)."""
    H = text.shape[-1]
    cls = text[:, 0, :]
    img_proj = img @ p["wip"] + p["bip"]
    img_q = img_proj @ p["wiq"] + p["biq"]
    text_k = jnp.einsum("bsh,hk->bsk", text, p["wtk"]) + p["btk"]
    text_v = jnp.einsum("bsh,hk->bsk", text, p["wtv"]) + p["btv"]
    scores = jnp.einsum("bh,bsh->bs", img_q, text_k) / math.sqrt(H)
    attn = jax.nn.softmax(scores, axis=-1)
    img_ctx = jnp.einsum("bs,bsh->bh", attn, text_v)
    img_ctx = _layernorm(img_ctx + img_proj, p["gin"], p["bin"])
    text_q = cls @ p["wtq"] + p["btq"]
    img_k = img_proj @ p["wik"] + p["bik"]
    img_v = img_proj @ p["wiv"] + p["biv"]
    t_scores = jnp.sum(text_q * img_k, axis=-1, keepdims=True) / math.sqrt(H)
    t_attn = jax.nn.softmax(t_scores, axis=-1)            # == 1.0
    text_ctx = _layernorm(t_attn * img_v + cls, p["gtn"], p["btn"])
    combined = jnp.concatenate([text_ctx, img_ctx], axis=-1)
    gate = jax.nn.softmax(combined @ p["wg"] + p["bg"], axis=-1)
    mm = jnp.concatenate([text_ctx * gate[:, 0:1], img_ctx * gate[:, 1:2]], axis=-1)
    fused = _layernorm(mm @ p["wf"] + p["bf"], p["gf"], p["bfn"])
    return _gelu_exact(fused)


if __name__ == "__main__":
    B, S, HIDDEN, IMG_DIM = 2, 8, 32, 48  # text_dim == hidden (unused by forward)

    key = jax.random.PRNGKey(0)
    k_text, k_img, k_params = jax.random.split(key, 3)
    text_features = jax.random.normal(k_text, (B, S, HIDDEN), jnp.float32)
    image_features = jax.random.normal(k_img, (B, IMG_DIM), jnp.float32)
    params = init_params(k_params, IMG_DIM, HIDDEN)
    packed = pack_params(params, HIDDEN)

    out = multimodal_fusion(text_features, image_features, packed)
    jax.block_until_ready(out)
    assert out.shape == (B, HIDDEN) and out.dtype == jnp.float32

    ref = reference_forward(text_features, image_features, params)
    assert jnp.allclose(out, ref, atol=1e-4, rtol=1e-4), "mismatch vs reference"
    print("KERNEL_OK")
</pallas_src>

<mosaic_0001>
module attributes {stable_mosaic.version = 11 : i64} {
  func.func @fusion_kernel(%arg0: memref<16x32xf32, #tpu.memory_space<vmem>>, %arg1: memref<2x48xf32, #tpu.memory_space<vmem>>, %arg2: memref<48x32xf32, #tpu.memory_space<vmem>>, %arg3: memref<6x32x32xf32, #tpu.memory_space<vmem>>, %arg4: memref<15x32xf32, #tpu.memory_space<vmem>>, %arg5: memref<2x32xf32, #tpu.memory_space<vmem>>) attributes {dimension_semantics = [], scalar_prefetch = 0 : i64, scratch_operands = 0 : i64, tpu.core_type = #tpu.core_type<tc>} {
    %c0 = arith.constant 0 : index
    %c0_0 = arith.constant 0 : index
    %0 = vector.load %arg0[%c0, %c0_0] : memref<16x32xf32, #tpu.memory_space<vmem>>, vector<16x32xf32>
    %c0_1 = arith.constant 0 : index
    %c0_2 = arith.constant 0 : index
    %1 = vector.load %arg1[%c0_1, %c0_2] : memref<2x48xf32, #tpu.memory_space<vmem>>, vector<2x48xf32>
    %c0_3 = arith.constant 0 : index
    %c0_4 = arith.constant 0 : index
    %2 = vector.load %arg4[%c0_3, %c0_4] : memref<15x32xf32, #tpu.memory_space<vmem>>, vector<15x32xf32>
    %3 = vector.extract_strided_slice %0 {offsets = [0, 0], sizes = [1, 32], strides = [1, 1]} : vector<16x32xf32> to vector<1x32xf32>
    %4 = vector.extract_strided_slice %0 {offsets = [8, 0], sizes = [1, 32], strides = [1, 1]} : vector<16x32xf32> to vector<1x32xf32>
    %5 = tpu.concatenate %3, %4 in 0 : vector<1x32xf32>, vector<1x32xf32> -> vector<2x32xf32>
    %c0_5 = arith.constant 0 : index
    %c0_6 = arith.constant 0 : index
    %6 = vector.load %arg2[%c0_5, %c0_6] : memref<48x32xf32, #tpu.memory_space<vmem>>, vector<48x32xf32>
    %cst = arith.constant dense<0.000000e+00> : vector<2x32xf32>
    %7 = tpu.matmul %1, %6, %cst {dimension_numbers = #tpu.dot_dimension_numbers<[1], [0], [0], [1], [0, 0, 1, 1], [], []>} : vector<2x48xf32>, vector<48x32xf32>, vector<2x32xf32> -> vector<2x32xf32>
    %8 = vector.extract_strided_slice %2 {offsets = [0, 0], sizes = [1, 32], strides = [1, 1]} : vector<15x32xf32> to vector<1x32xf32>
    %9 = vector.broadcast %8 : vector<1x32xf32> to vector<2x32xf32>
    %10 = arith.addf %7, %9 : vector<2x32xf32>
    %c0_7 = arith.constant 0 : index
    %c0_8 = arith.constant 0 : index
    %c0_9 = arith.constant 0 : index
    %11 = vector.load %arg3[%c0_7, %c0_8, %c0_9] : memref<6x32x32xf32, #tpu.memory_space<vmem>>, vector<1x32x32xf32>
    %12 = vector.shape_cast %11 : vector<1x32x32xf32> to vector<32x32xf32>
    %cst_10 = arith.constant dense<0.000000e+00> : vector<2x32xf32>
    %13 = tpu.matmul %10, %12, %cst_10 {dimension_numbers = #tpu.dot_dimension_numbers<[1], [0], [0], [1], [0, 0, 1, 1], [], []>} : vector<2x32xf32>, vector<32x32xf32>, vector<2x32xf32> -> vector<2x32xf32>
    %14 = vector.extract_strided_slice %2 {offsets = [1, 0], sizes = [1, 32], strides = [1, 1]} : vector<15x32xf32> to vector<1x32xf32>
    %15 = vector.broadcast %14 : vector<1x32xf32> to vector<2x32xf32>
    %16 = arith.addf %13, %15 : vector<2x32xf32>
    %17 = arith.addf %16, %5 : vector<2x32xf32>
    %18 = vector.extract_strided_slice %2 {offsets = [7, 0], sizes = [1, 32], strides = [1, 1]} : vector<15x32xf32> to vector<1x32xf32>
    %19 = vector.extract_strided_slice %2 {offsets = [8, 0], sizes = [1, 32], strides = [1, 1]} : vector<15x32xf32> to vector<1x32xf32>
    %cst_11 = arith.constant dense<0.000000e+00> : vector<2xf32>
    %20 = vector.multi_reduction <add>, %17, %cst_11 [1] : vector<2x32xf32> to vector<2xf32>
    %21 = vector.shape_cast %20 : vector<2xf32> to vector<2x1xf32>
    %cst_12 = arith.constant 3.200000e+01 : f32
    %22 = vector.broadcast %cst_12 : f32 to vector<2x1xf32>
    %23 = arith.divf %21, %22 : vector<2x1xf32>
    %24 = vector.broadcast %23 : vector<2x1xf32> to vector<2x32xf32>
    %25 = arith.subf %17, %24 : vector<2x32xf32>
    %26 = arith.mulf %25, %25 : vector<2x32xf32>
    %cst_13 = arith.constant dense<0.000000e+00> : vector<2xf32>
    %27 = vector.multi_reduction <add>, %26, %cst_13 [1] : vector<2x32xf32> to vector<2xf32>
    %28 = vector.shape_cast %27 : vector<2xf32> to vector<2x1xf32>
    %cst_14 = arith.constant 3.200000e+01 : f32
    %29 = vector.broadcast %cst_14 : f32 to vector<2x1xf32>
    %30 = arith.divf %28, %29 : vector<2x1xf32>
    %31 = vector.broadcast %23 : vector<2x1xf32> to vector<2x32xf32>
    %32 = arith.subf %17, %31 : vector<2x32xf32>
    %cst_15 = arith.constant 9.99999974E-6 : f32
    %33 = vector.broadcast %cst_15 : f32 to vector<2x1xf32>
    %34 = arith.addf %30, %33 : vector<2x1xf32>
    %35 = math.rsqrt %34 : vector<2x1xf32>
    %36 = vector.broadcast %35 : vector<2x1xf32> to vector<2x32xf32>
    %37 = arith.mulf %32, %36 : vector<2x32xf32>
    %38 = vector.broadcast %18 : vector<1x32xf32> to vector<2x32xf32>
    %39 = arith.mulf %37, %38 : vector<2x32xf32>
    %40 = vector.broadcast %19 : vector<1x32xf32> to vector<2x32xf32>
    %41 = arith.addf %39, %40 : vector<2x32xf32>
    %c1 = arith.constant 1 : index
    %c0_16 = arith.constant 0 : index
    %c0_17 = arith.constant 0 : index
    %42 = vector.load %arg3[%c1, %c0_16, %c0_17] : memref<6x32x32xf32, #tpu.memory_space<vmem>>, vector<1x32x32xf32>
    %43 = vector.shape_cast %42 : vector<1x32x32xf32> to vector<32x32xf32>
    %cst_18 = arith.constant dense<0.000000e+00> : vector<2x32xf32>
    %44 = tpu.matmul %10, %43, %cst_18 {dimension_numbers = #tpu.dot_dimension_numbers<[1], [0], [0], [1], [0, 0, 1, 1], [], []>} : vector<2x32xf32>, vector<32x32xf32>, vector<2x32xf32> -> vector<2x32xf32>
    %45 = vector.extract_strided_slice %2 {offsets = [2, 0], sizes = [1, 32], strides = [1, 1]} : vector<15x32xf32> to vector<1x32xf32>
    %46 = vector.broadcast %45 : vector<1x32xf32> to vector<2x32xf32>
    %47 = arith.addf %44, %46 : vector<2x32xf32>
    %cst_19 = arith.constant 0.176776692 : f32
    %48 = vector.broadcast %cst_19 : f32 to vector<2x32xf32>
    %49 = arith.mulf %47, %48 : vector<2x32xf32>
    %c2 = arith.constant 2 : index
    %c0_20 = arith.constant 0 : index
    %c0_21 = arith.constant 0 : index
    %50 = vector.load %arg3[%c2, %c0_20, %c0_21] : memref<6x32x32xf32, #tpu.memory_space<vmem>>, vector<1x32x32xf32>
    %51 = vector.shape_cast %50 : vector<1x32x32xf32> to vector<32x32xf32>
    %cst_22 = arith.constant dense<0.000000e+00> : vector<16x32xf32>
    %52 = tpu.matmul %0, %51, %cst_22 {dimension_numbers = #tpu.dot_dimension_numbers<[1], [0], [0], [1], [0, 0, 1, 1], [], []>} : vector<16x32xf32>, vector<32x32xf32>, vector<16x32xf32> -> vector<16x32xf32>
    %53 = vector.extract_strided_slice %2 {offsets = [3, 0], sizes = [1, 32], strides = [1, 1]} : vector<15x32xf32> to vector<1x32xf32>
    %54 = vector.broadcast %53 : vector<1x32xf32> to vector<16x32xf32>
    %55 = arith.addf %52, %54 : vector<16x32xf32>
    %c3 = arith.constant 3 : index
    %c0_23 = arith.constant 0 : index
    %c0_24 = arith.constant 0 : index
    %56 = vector.load %arg3[%c3, %c0_23, %c0_24] : memref<6x32x32xf32, #tpu.memory_space<vmem>>, vector<1x32x32xf32>
    %57 = vector.shape_cast %56 : vector<1x32x32xf32> to vector<32x32xf32>
    %cst_25 = arith.constant dense<0.000000e+00> : vector<16x32xf32>
    %58 = tpu.matmul %0, %57, %cst_25 {dimension_numbers = #tpu.dot_dimension_numbers<[1], [0], [0], [1], [0, 0, 1, 1], [], []>} : vector<16x32xf32>, vector<32x32xf32>, vector<16x32xf32> -> vector<16x32xf32>
    %59 = vector.extract_strided_slice %2 {offsets = [4, 0], sizes = [1, 32], strides = [1, 1]} : vector<15x32xf32> to vector<1x32xf32>
    %60 = vector.broadcast %59 : vector<1x32xf32> to vector<16x32xf32>
    %61 = arith.addf %58, %60 : vector<16x32xf32>
    %62 = vector.extract_strided_slice %55 {offsets = [0, 0], sizes = [8, 32], strides = [1, 1]} : vector<16x32xf32> to vector<8x32xf32>
    %63 = vector.extract_strided_slice %61 {offsets = [0, 0], sizes = [8, 32], strides = [1, 1]} : vector<16x32xf32> to vector<8x32xf32>
    %64 = vector.extract_strided_slice %49 {offsets = [0, 0], sizes = [1, 32], strides = [1, 1]} : vector<2x32xf32> to vector<1x32xf32>
    %cst_26 = arith.constant dense<0.000000e+00> : vector<1x8xf32>
    %65 = tpu.matmul %64, %62, %cst_26 {dimension_numbers = #tpu.dot_dimension_numbers<[1], [1], [0], [0], [0, 0, 1, 0], [], []>} : vector<1x32xf32>, vector<8x32xf32>, vector<1x8xf32> -> vector<1x8xf32>
    %cst_27 = arith.constant dense<0xFF800000> : vector<1xf32>
    %66 = vector.multi_reduction <maximumf>, %65, %cst_27 [1] : vector<1x8xf32> to vector<1xf32>
    %67 = vector.shape_cast %66 : vector<1xf32> to vector<1x1xf32>
    %68 = vector.broadcast %67 : vector<1x1xf32> to vector<1x8xf32>
    %69 = arith.subf %65, %68 : vector<1x8xf32>
    %70 = math.exp %69 : vector<1x8xf32>
    %cst_28 = arith.constant dense<0.000000e+00> : vector<1xf32>
    %71 = vector.multi_reduction <add>, %70, %cst_28 [1] : vector<1x8xf32> to vector<1xf32>
    %72 = vector.shape_cast %71 : vector<1xf32> to vector<1x1xf32>
    %73 = vector.broadcast %72 : vector<1x1xf32> to vector<1x8xf32>
    %74 = arith.divf %70, %73 : vector<1x8xf32>
    %cst_29 = arith.constant dense<0.000000e+00> : vector<1x32xf32>
    %75 = tpu.matmul %74, %63, %cst_29 {dimension_numbers = #tpu.dot_dimension_numbers<[1], [0], [0], [1], [0, 0, 1, 1], [], []>} : vector<1x8xf32>, vector<8x32xf32>, vector<1x32xf32> -> vector<1x32xf32>
    %76 = vector.extract_strided_slice %55 {offsets = [8, 0], sizes = [8, 32], strides = [1, 1]} : vector<16x32xf32> to vector<8x32xf32>
    %77 = vector.extract_strided_slice %61 {offsets = [8, 0], sizes = [8, 32], strides = [1, 1]} : vector<16x32xf32> to vector<8x32xf32>
    %78 = vector.extract_strided_slice %49 {offsets = [1, 0], sizes = [1, 32], strides = [1, 1]} : vector<2x32xf32> to vector<1x32xf32>
    %cst_30 = arith.constant dense<0.000000e+00> : vector<1x8xf32>
    %79 = tpu.matmul %78, %76, %cst_30 {dimension_numbers = #tpu.dot_dimension_numbers<[1], [1], [0], [0], [0, 0, 1, 0], [], []>} : vector<1x32xf32>, vector<8x32xf32>, vector<1x8xf32> -> vector<1x8xf32>
    %cst_31 = arith.constant dense<0xFF800000> : vector<1xf32>
    %80 = vector.multi_reduction <maximumf>, %79, %cst_31 [1] : vector<1x8xf32> to vector<1xf32>
    %81 = vector.shape_cast %80 : vector<1xf32> to vector<1x1xf32>
    %82 = vector.broadcast %81 : vector<1x1xf32> to vector<1x8xf32>
    %83 = arith.subf %79, %82 : vector<1x8xf32>
    %84 = math.exp %83 : vector<1x8xf32>
    %cst_32 = arith.constant dense<0.000000e+00> : vector<1xf32>
    %85 = vector.multi_reduction <add>, %84, %cst_32 [1] : vector<1x8xf32> to vector<1xf32>
    %86 = vector.shape_cast %85 : vector<1xf32> to vector<1x1xf32>
    %87 = vector.broadcast %86 : vector<1x1xf32> to vector<1x8xf32>
    %88 = arith.divf %84, %87 : vector<1x8xf32>
    %cst_33 = arith.constant dense<0.000000e+00> : vector<1x32xf32>
    %89 = tpu.matmul %88, %77, %cst_33 {dimension_numbers = #tpu.dot_dimension_numbers<[1], [0], [0], [1], [0, 0, 1, 1], [], []>} : vector<1x8xf32>, vector<8x32xf32>, vector<1x32xf32> -> vector<1x32xf32>
    %90 = tpu.concatenate %75, %89 in 0 : vector<1x32xf32>, vector<1x32xf32> -> vector<2x32xf32>
    %91 = arith.addf %90, %10 : vector<2x32xf32>
    %92 = vector.extract_strided_slice %2 {offsets = [5, 0], sizes = [1, 32], strides = [1, 1]} : vector<15x32xf32> to vector<1x32xf32>
    %93 = vector.extract_strided_slice %2 {offsets = [6, 0], sizes = [1, 32], strides = [1, 1]} : vector<15x32xf32> to vector<1x32xf32>
    %cst_34 = arith.constant dense<0.000000e+00> : vector<2xf32>
    %94 = vector.multi_reduction <add>, %91, %cst_34 [1] : vector<2x32xf32> to vector<2xf32>
    %95 = vector.shape_cast %94 : vector<2xf32> to vector<2x1xf32>
    %cst_35 = arith.constant 3.200000e+01 : f32
    %96 = vector.broadcast %cst_35 : f32 to vector<2x1xf32>
    %97 = arith.divf %95, %96 : vector<2x1xf32>
    %98 = vector.broadcast %97 : vector<2x1xf32> to vector<2x32xf32>
    %99 = arith.subf %91, %98 : vector<2x32xf32>
    %100 = arith.mulf %99, %99 : vector<2x32xf32>
    %cst_36 = arith.constant dense<0.000000e+00> : vector<2xf32>
    %101 = vector.multi_reduction <add>, %100, %cst_36 [1] : vector<2x32xf32> to vector<2xf32>
    %102 = vector.shape_cast %101 : vector<2xf32> to vector<2x1xf32>
    %cst_37 = arith.constant 3.200000e+01 : f32
    %103 = vector.broadcast %cst_37 : f32 to vector<2x1xf32>
    %104 = arith.divf %102, %103 : vector<2x1xf32>
    %105 = vector.broadcast %97 : vector<2x1xf32> to vector<2x32xf32>
    %106 = arith.subf %91, %105 : vector<2x32xf32>
    %cst_38 = arith.constant 9.99999974E-6 : f32
    %107 = vector.broadcast %cst_38 : f32 to vector<2x1xf32>
    %108 = arith.addf %104, %107 : vector<2x1xf32>
    %109 = math.rsqrt %108 : vector<2x1xf32>
    %110 = vector.broadcast %109 : vector<2x1xf32> to vector<2x32xf32>
    %111 = arith.mulf %106, %110 : vector<2x32xf32>
    %112 = vector.broadcast %92 : vector<1x32xf32> to vector<2x32xf32>
    %113 = arith.mulf %111, %112 : vector<2x32xf32>
    %114 = vector.broadcast %93 : vector<1x32xf32> to vector<2x32xf32>
    %115 = arith.addf %113, %114 : vector<2x32xf32>
    %116 = vector.extract_strided_slice %2 {offsets = [12, 0], sizes = [1, 32], strides = [1, 1]} : vector<15x32xf32> to vector<1x32xf32>
    %117 = vector.broadcast %116 : vector<1x32xf32> to vector<2x32xf32>
    %118 = arith.mulf %41, %117 : vector<2x32xf32>
    %cst_39 = arith.constant dense<0.000000e+00> : vector<2xf32>
    %119 = vector.multi_reduction <add>, %118, %cst_39 [1] : vector<2x32xf32> to vector<2xf32>
    %120 = vector.shape_cast %119 : vector<2xf32> to vector<2x1xf32>
    %121 = vector.extract_strided_slice %2 {offsets = [13, 0], sizes = [1, 32], strides = [1, 1]} : vector<15x32xf32> to vector<1x32xf32>
    %122 = vector.broadcast %121 : vector<1x32xf32> to vector<2x32xf32>
    %123 = arith.mulf %115, %122 : vector<2x32xf32>
    %cst_40 = arith.constant dense<0.000000e+00> : vector<2xf32>
    %124 = vector.multi_reduction <add>, %123, %cst_40 [1] : vector<2x32xf32> to vector<2xf32>
    %125 = vector.shape_cast %124 : vector<2xf32> to vector<2x1xf32>
    %126 = arith.addf %120, %125 : vector<2x1xf32>
    %127 = vector.extract_strided_slice %2 {offsets = [14, 0], sizes = [1, 1], strides = [1, 1]} : vector<15x32xf32> to vector<1x1xf32>
    %128 = vector.broadcast %127 : vector<1x1xf32> to vector<2x1xf32>
    %129 = arith.addf %126, %128 : vector<2x1xf32>
    %cst_41 = arith.constant 0.000000e+00 : f32
    %130 = vector.broadcast %cst_41 : f32 to vector<2x1xf32>
    %131 = arith.subf %130, %129 : vector<2x1xf32>
    %132 = math.exp %131 : vector<2x1xf32>
    %cst_42 = arith.constant 1.000000e+00 : f32
    %133 = vector.broadcast %cst_42 : f32 to vector<2x1xf32>
    %134 = arith.addf %133, %132 : vector<2x1xf32>
    %cst_43 = arith.constant 1.000000e+00 : f32
    %135 = vector.broadcast %cst_43 : f32 to vector<2x1xf32>
    %136 = arith.divf %135, %134 : vector<2x1xf32>
    %cst_44 = arith.constant 1.000000e+00 : f32
    %137 = vector.broadcast %cst_44 : f32 to vector<2x1xf32>
    %138 = arith.subf %137, %136 : vector<2x1xf32>
    %139 = vector.broadcast %136 : vector<2x1xf32> to vector<2x32xf32>
    %140 = arith.mulf %41, %139 : vector<2x32xf32>
    %141 = vector.broadcast %138 : vector<2x1xf32> to vector<2x32xf32>
    %142 = arith.mulf %115, %141 : vector<2x32xf32>
    %c4 = arith.constant 4 : index
    %c0_45 = arith.constant 0 : index
    %c0_46 = arith.constant 0 : index
    %143 = vector.load %arg3[%c4, %c0_45, %c0_46] : memref<6x32x32xf32, #tpu.memory_space<vmem>>, vector<1x32x32xf32>
    %144 = vector.shape_cast %143 : vector<1x32x32xf32> to vector<32x32xf32>
    %cst_47 = arith.constant dense<0.000000e+00> : vector<2x32xf32>
    %145 = tpu.matmul %140, %144, %cst_47 {dimension_numbers = #tpu.dot_dimension_numbers<[1], [0], [0], [1], [0, 0, 1, 1], [], []>} : vector<2x32xf32>, vector<32x32xf32>, vector<2x32xf32> -> vector<2x32xf32>
    %c5 = arith.constant 5 : index
    %c0_48 = arith.constant 0 : index
    %c0_49 = arith.constant 0 : index
    %146 = vector.load %arg3[%c5, %c0_48, %c0_49] : memref<6x32x32xf32, #tpu.memory_space<vmem>>, vector<1x32x32xf32>
    %147 = vector.shape_cast %146 : vector<1x32x32xf32> to vector<32x32xf32>
    %cst_50 = arith.constant dense<0.000000e+00> : vector<2x32xf32>
    %148 = tpu.matmul %142, %147, %cst_50 {dimension_numbers = #tpu.dot_dimension_numbers<[1], [0], [0], [1], [0, 0, 1, 1], [], []>} : vector<2x32xf32>, vector<32x32xf32>, vector<2x32xf32> -> vector<2x32xf32>
    %149 = arith.addf %145, %148 : vector<2x32xf32>
    %150 = vector.extract_strided_slice %2 {offsets = [9, 0], sizes = [1, 32], strides = [1, 1]} : vector<15x32xf32> to vector<1x32xf32>
    %151 = vector.broadcast %150 : vector<1x32xf32> to vector<2x32xf32>
    %152 = arith.addf %149, %151 : vector<2x32xf32>
    %153 = vector.extract_strided_slice %2 {offsets = [10, 0], sizes = [1, 32], strides = [1, 1]} : vector<15x32xf32> to vector<1x32xf32>
    %154 = vector.extract_strided_slice %2 {offsets = [11, 0], sizes = [1, 32], strides = [1, 1]} : vector<15x32xf32> to vector<1x32xf32>
    %cst_51 = arith.constant dense<0.000000e+00> : vector<2xf32>
    %155 = vector.multi_reduction <add>, %152, %cst_51 [1] : vector<2x32xf32> to vector<2xf32>
    %156 = vector.shape_cast %155 : vector<2xf32> to vector<2x1xf32>
    %cst_52 = arith.constant 3.200000e+01 : f32
    %157 = vector.broadcast %cst_52 : f32 to vector<2x1xf32>
    %158 = arith.divf %156, %157 : vector<2x1xf32>
    %159 = vector.broadcast %158 : vector<2x1xf32> to vector<2x32xf32>
    %160 = arith.subf %152, %159 : vector<2x32xf32>
    %161 = arith.mulf %160, %160 : vector<2x32xf32>
    %cst_53 = arith.constant dense<0.000000e+00> : vector<2xf32>
    %162 = vector.multi_reduction <add>, %161, %cst_53 [1] : vector<2x32xf32> to vector<2xf32>
    %163 = vector.shape_cast %162 : vector<2xf32> to vector<2x1xf32>
    %cst_54 = arith.constant 3.200000e+01 : f32
    %164 = vector.broadcast %cst_54 : f32 to vector<2x1xf32>
    %165 = arith.divf %163, %164 : vector<2x1xf32>
    %166 = vector.broadcast %158 : vector<2x1xf32> to vector<2x32xf32>
    %167 = arith.subf %152, %166 : vector<2x32xf32>
    %cst_55 = arith.constant 9.99999974E-6 : f32
    %168 = vector.broadcast %cst_55 : f32 to vector<2x1xf32>
    %169 = arith.addf %165, %168 : vector<2x1xf32>
    %170 = math.rsqrt %169 : vector<2x1xf32>
    %171 = vector.broadcast %170 : vector<2x1xf32> to vector<2x32xf32>
    %172 = arith.mulf %167, %171 : vector<2x32xf32>
    %173 = vector.broadcast %153 : vector<1x32xf32> to vector<2x32xf32>
    %174 = arith.mulf %172, %173 : vector<2x32xf32>
    %175 = vector.broadcast %154 : vector<1x32xf32> to vector<2x32xf32>
    %176 = arith.addf %174, %175 : vector<2x32xf32>
    %cst_56 = arith.constant 5.000000e-01 : f32
    %177 = vector.broadcast %cst_56 : f32 to vector<2x32xf32>
    %178 = arith.mulf %177, %176 : vector<2x32xf32>
    %cst_57 = arith.constant 0.707106769 : f32
    %179 = vector.broadcast %cst_57 : f32 to vector<2x32xf32>
    %180 = arith.mulf %176, %179 : vector<2x32xf32>
    %181 = math.erf %180 : vector<2x32xf32>
    %cst_58 = arith.constant 1.000000e+00 : f32
    %182 = vector.broadcast %cst_58 : f32 to vector<2x32xf32>
    %183 = arith.addf %182, %181 : vector<2x32xf32>
    %184 = arith.mulf %178, %183 : vector<2x32xf32>
    %c0_59 = arith.constant 0 : index
    %c0_60 = arith.constant 0 : index
    %185 = vector.load %arg5[%c0_59, %c0_60] : memref<2x32xf32, #tpu.memory_space<vmem>>, vector<2x32xf32>
    tpu.vector_store %arg5[%c0_59, %c0_60], %184 {strides = array<i32>} : memref<2x32xf32, #tpu.memory_space<vmem>>, vector<2x32xf32>,
    return
  }
}

</mosaic_0001>

<bundles_post_ra>
// kernel: tpu_custom_call.1
= control target key start
LH: loop header
LB: loop body
LE: loop exit
PB: predicated region body
PF: predicated region fallthrough
CT: control target
= control target key end

     0   :  { %10 = vsyncpa [#allocation3], 0  ;;  %s1599_s0 = inlined_call_operand.vmem [shape: f32[16,32], index: 0, kind: input, shape index: {}]   ;;  %s1600_s1 = inlined_call_operand.vmem [shape: f32[2,48], index: 1, kind: input, shape index: {}]   ;;  %s1601_s2 = inlined_call_operand.vmem [shape: f32[48,32], index: 2, kind: input, shape index: {}]   ;;  %s1602_s3 = inlined_call_operand.hbm [shape: f32[6,32,32], index: 3, kind: input, shape index: {}]   ;;  %s1603_s4 = inlined_call_operand.vmem [shape: f32[15,32], index: 4, kind: input, shape index: {}]   ;;  %s1604_s5 = inlined_call_operand.hbm [shape: f32[2,32], index: 5, kind: output, shape index: {}]  }
   0x1   :  { %11 = vsyncpa [#allocation4], 0  ;;  %s1376_s18 = smov [#allocation2]   ;;  %s1328_s22 = scalar_lea.hbm %s1602_s3, 3072 }
   0x2   :  { %s23_s19 = sshll.u32 %s1376_s18, 4  ;;  %p1329_p0 = scmp.ne.s32.totalorder %s1602_s3, %s1328_s22  ;;  %s24_s19 = int_to_ptr.vmem [resolvable:$true] %s23_s19 }
   0x3   :  { %p1332_p1 = scmp.lt.u32.totalorder %s1328_s22, %s1602_s3 }
   0x5   :  { %p1334_p2 = pnand %p1332_p1, %p1329_p0 }
   0x7   :  { %1337 = shalt.err (!%p1334_p2)
}
   0x8   :  { %s1338_s27 = scalar_lea.vmem %s24_s19, 3072  ;;  %p1343_p4 = scmp.lt.s32.totalorder %s24_s19, %s24_s19 }
   0x9   :  { %p1339_p3 = scmp.ne.s32.totalorder %s24_s19, %s1338_s27  ;;  %p1344_p5 = scmp.lt.s32.totalorder %s1338_s27, %s1338_s27 }
   0xb   :  { %p1345_p6 = por %p1344_p5, %p1343_p4 }
   0xd   :  { %p1346_p7 = pnand %p1345_p6, %p1339_p3 }
   0xf   :  { %1349 = shalt.err (!%p1346_p7)
}
  0x10   :  { %s1377_s28 = smov 128   ;;  %s1378_s29 = smov 8  }
  0x11   :  { %29 = dma.hbm_to_vmem [thread:$0]  %s1602_s3, 3072, %s24_s19, [#allocation3], %s1377_s28, %s1377_s28, %s1378_s29  }
  0x12   :  { %1372 = dma.done.wait [#allocation3], 3072  }
  0x13   :  { %1373 = vsyncadd [#allocation3], 4294964224  ;;  %v1379_v0 = vmov 0.0|0.0   ;;  %vm1380_vm0 = vmmov 0   ;;  %v1381_v1 = vmov 0.0   ;;  %v45_v2 = vld [vmem:[%s1601_s2] sm:$0xff]  ;;  %v51_v26 = vlaneseq }
  0x14   :  { %1249 = vmatprep.subr.bf16.mxu0 %v1379_v0  ;;  %1160 = vmatprep.mubr.msk.f32.mxu0 %vm1380_vm0, %v1381_v1  ;;  %v46_v3 = vld [vmem:[%s1601_s2 + $0x8] sm:$0xff]  ;;  %v47_v4 = vld [vmem:[%s1601_s2 + $0x10] sm:$0xff]  ;;  %v48_v6 = vld [vmem:[%s1601_s2 + $0x18] sm:$0xff]  ;;  %vm55_vm1 = vcmask 392192   ;;  %vm137_vm2 = vcmask 261120   ;;  %vm566_vm3 = vcmask 57344  }
  0x15   :  { %1258 = vmatprep.subr.bf16.mxu1 %v1379_v0  ;;  %1171 = vmatprep.mubr.msk.f32.mxu1 %vm1380_vm0, %v1381_v1  ;;  %v1250_v5 = vpack.c.bf16 %v46_v3, %v45_v2  ;;  %v129_v7 = vld [vmem:[#allocation2] sm:$0xff]  ;;  %v130_v8 = vld [vmem:[#allocation2 + $0x8] sm:$0xff]  ;;  %v1253_v9 = vpack.c.bf16 %v48_v6, %v47_v4  ;;  %v131_v11 = vld [vmem:[#allocation2 + $0x10] sm:$0xff]  ;;  %v1474_v27 = vshrl.u32 %v51_v26, 7  ;;  %vm43_vm4 = vcmask 1040384  }
  0x16   :  { %v1259_v10 = vpack.c.bf16 %v130_v8, %v129_v7  ;;  %v49_v12 = vld [vmem:[%s1601_s2 + $0x20] sm:$0xff]  ;;  %v50_v13 = vld [vmem:[%s1601_s2 + $0x28] sm:$0xff]  ;;  %v132_v14 = vld [vmem:[#allocation2 + $0x18] sm:$0xff]  ;;  %vm212_vm5 = vcmask 254976   ;;  %vm578_vm6 = vcmask 64512  }
  0x17   :  { %1251 = vmatpush3.bf16.msra.mxu0 %v1250_v5  ;;  %v318_v15 = vld [vmem:[#allocation2 + $0x40] sm:$0xff]  ;;  %v319_v16 = vld [vmem:[#allocation2 + $0x48] sm:$0xff]  ;;  %v1262_v17 = vpack.c.bf16 %v132_v14, %v131_v11  ;;  %v1256_v18 = vpack.c.bf16 %v50_v13, %v49_v12  ;;  %v320_v21 = vld [vmem:[#allocation2 + $0x50] sm:$0xff]  ;;  %v53_v28 = vsub.s32 0, %v1474_v27  ;;  %v324_v46 = vsub.s32 3, %v1474_v27 }
  0x18   :  { %1252 = vmatprep.subr.bf16.mxu0 %v1379_v0  ;;  %1260 = vmatpush3.bf16.msra.mxu1 %v1259_v10  ;;  %v1270_v19 = vpack.c.bf16 %v319_v16, %v318_v15  ;;  %v37_v20 = vld [vmem:[%s1600_s1] sm:$0x3]  ;;  %v321_v22 = vld [vmem:[#allocation2 + $0x58] sm:$0xff]  ;;  %v1467_v25 = vld [vmem:[%s1599_s0 + $0x8] sm:$0xff]  ;;  %v244_v54 = vsub.s32 2, %v1474_v27  ;;  %v413_v59 = vsub.s32 4, %v1474_v27 }
  0x19   :  { %1261 = vmatprep.subr.bf16.mxu1 %v1379_v0  ;;  %v1274_v23 = vpack.c.bf16 %v321_v22, %v320_v21  ;;  %v1460_v24 = vld [vmem:[%s1599_s0] sm:$0xff]  ;;  %v239_v32 = vld [vmem:[#allocation2 + $0x28] sm:$0xff]  ;;  %v240_v37 = vld [vmem:[#allocation2 + $0x30] sm:$0xff]  ;;  %v135_v5 = vsub.s32 1, %v1474_v27  ;;  %v41_v7 = vrot.slane %v1467_v25, 7 }
  0x1a   :  { %v1480_v29 = vld [vmem:[%s1603_s4] sm:$0xff]  ;;  %v241_v38 = vld [vmem:[#allocation2 + $0x38] sm:$0xff]  ;;  %v408_v40 = vld [vmem:[#allocation2 + $0x68] sm:$0xff] }
  0x1b   :  { %1254 = vmatpush3.bf16.msra.mxu0 %v1253_v9  ;;  %v54_v30 = vrot.slane %v1480_v29, %v53_v28  ;;  %v238_v31 = vld [vmem:[#allocation2 + $0x20] sm:$0xff]  ;;  %v1268_v41 = vpack.c.bf16 %v241_v38, %v240_v37  ;;  %v409_v43 = vld [vmem:[#allocation2 + $0x70] sm:$0xff]  ;;  %v410_v44 = vld [vmem:[#allocation2 + $0x78] sm:$0xff]  ;;  %v325_v47 = vrot.slane %v1480_v29, %v324_v46  ;;  %v245_v55 = vrot.slane %v1480_v29, %v244_v54 }
  0x1c   :  { %1255 = vmatprep.subr.bf16.mxu0 %v1379_v0  ;;  %1263 = vmatpush3.bf16.msra.mxu1 %v1262_v17  ;;  %v1265_v34 = vpack.c.bf16 %v239_v32, %v238_v31  ;;  %v407_v39 = vld [vmem:[#allocation2 + $0x60] sm:$0xff]  ;;  %v1282_v45 = vpack.c.bf16 %v410_v44, %v409_v43  ;;  %v414_v62 = vrot.slane %v1480_v29, %v413_v59  ;;  %v1541_v44 = vld [vmem:[%s1603_s4 + $0x8] sm:$0x7f]  ;;  %s1383_s4 = smov [#allocation5]  }
  0x1d   :  { %1264 = vmatprep.subr.bf16.mxu1 %v1379_v0  ;;  %v1278_v42 = vpack.c.bf16 %v408_v40, %v407_v39  ;;  %v136_v6 = vrot.slane %v1480_v29, %v135_v5  ;;  %v44_v13 = vsel %vm43_vm4, %v1460_v24, %v41_v7  ;;  %s1077_s25 = sshll.u32 %s1383_s4, 4  ;;  %s1078_s25 = int_to_ptr.vmem [resolvable:$true] %s1077_s25 }
  0x1e   :  { %s1350_s26 = scalar_lea.vmem %s1078_s25, 32  ;;  %p1355_p9 = scmp.lt.s32.totalorder %s1078_s25, %s1078_s25 }
  0x1f   :  { %1257 = vmatpush3.bf16.msra.mxu0 %v1256_v18  ;;  %p1351_p8 = scmp.ne.s32.totalorder %s1078_s25, %s1350_s26  ;;  %p1356_p10 = scmp.lt.s32.totalorder %s1350_s26, %s1350_s26 }
  0x20   :  { %1271 = vmatprep.subr.bf16.mxu0 %v1270_v19 }
  0x21   :  { %p1357_p11 = por %p1356_p10, %p1355_p9 }
  0x22   :  { %1161 = vmatmul.mubr.msk.f32.vlgmr.msra.gmra.mrb[0].mxu0 %vm55_vm1, %v37_v20 }
  0x23   :  { %1273 = vmatpush3.bf16.msra.mxu0 %v1270_v19  ;;  %1193 = vmatprep.mubr.msk.f32.mxu0 %vm137_vm2, %v1460_v24  ;;  %p1358_p12 = pnand %p1357_p11, %p1351_p8 }
  0x24   :  { %1275 = vmatprep.subr.bf16.mxu0 %v1274_v23 }
  0x27   :  { %1277 = vmatpush3.bf16.msra.mxu0 %v1274_v23 }
  0x28   :  { %1207 = vmatprep.subr.mxu0 %v1381_v1 }
  0x2a   :  { %1194 = vmatmul.mubr.msk.f32.vlgmr.msra.gmra.mrb[2].mxu0 %vm137_vm2, %v1467_v25 }
  0x2b   :  { %1209 = vmatprep.mubr.msk.f32.mxu0 %vm1380_vm0, %v1381_v1 }
  0xf5   :  { %v125_v33 = vpop.f32.mrb[0].mxu0 }
  0xf6   :  { %v1485_v35 = vadd.f32 %v125_v33, %v54_v30  ;;  %v1162_v36 = vpop.f32.mrb[1].mxu0 }
  0xf8   :  { %1172 = vmatmul.mubr.msk.f32.vlgmr.msra.gmra.mrb[0].mxu1 %vm137_vm2, %v1485_v35 }
  0xf9   :  { %1266 = vmatpush3.bf16.msra.mxu1 %v1265_v34  ;;  %1182 = vmatprep.mubr.msk.f32.mxu1 %vm1380_vm0, %v1381_v1 }
  0xfa   :  { %1267 = vmatprep.subr.bf16.mxu1 %v1379_v0 }
  0xfd   :  { %1269 = vmatpush3.bf16.msra.mxu1 %v1268_v41  ;;  %v1195_v48 = vpop.f32.mrb[2].mxu0 }
  0xfe   :  { %1279 = vmatprep.subr.bf16.mxu1 %v1278_v42  ;;  %v403_v49 = vadd.f32 %v1195_v48, %v325_v47  ;;  %v397_v50 = vpop.f32.mrb[3].mxu0 }
  0xff   :  { %v398_v51 = vadd.f32 %v397_v50, %v325_v47 }
 0x100   :  { %1183 = vmatmul.mubr.msk.f32.vlgmr.msra.gmra.mrb[2].mxu1 %vm137_vm2, %v1485_v35 }
 0x101   :  { %1281 = vmatpush3.bf16.msra.mxu1 %v1278_v42  ;;  %1204 = vmatprep.mubr.msk.f32.mxu1 %vm137_vm2, %v1460_v24  ;;  %v229_v42 = vsub.s32 7, %v1474_v27 }
 0x102   :  { %1283 = vmatprep.subr.bf16.mxu1 %v1282_v45  ;;  %1208 = vmatpush3.xpose.msk.msra.mxu0 %vm137_vm2, %v398_v51  ;;  %v235_v51 = vrot.slane %v1541_v44, %v53_v28 }
 0x103   :  { %1212 = vmatprep.subr.mxu0 %v1381_v1  ;;  %v230_v47 = vrot.slane %v1480_v29, %v229_v42 }
 0x105   :  { %1285 = vmatpush3.bf16.msra.mxu1 %v1282_v45 }
 0x106   :  { %1217 = vmatprep.subr.mxu1 %v1381_v1 }
 0x108   :  { %1205 = vmatmul.mubr.msk.f32.vlgmr.msra.gmra.mrb[4].mxu1 %vm137_vm2, %v1467_v25 }
 0x109   :  { %1219 = vmatprep.mubr.msk.f32.mxu1 %vm1380_vm0, %v1381_v1 }
 0x10e   :  { %1218 = vmatpush3.xpose.msk.msra.mxu1 %vm137_vm2, %v403_v49 }
 0x10f   :  { %1286 = vmatprep.subr.bf16.mxu1 %v1379_v0 }
 0x1cb   :  { %v207_v52 = vpop.f32.mrb[0].mxu1 }
 0x1cc   :  { %v1173_v53 = vpop.f32.mrb[1].mxu1  ;;  %v208_v9 = vadd.f32 %v207_v52, %v136_v6 }
 0x1ce   :  { %v211_v16 = vadd.f32 %v208_v9, %v44_v13  ;;  %v837_v13 = vsub.s32 6, %v1474_v27 }
 0x1d0   :  { %v213_v17 = vsel %vm212_vm5, %v211_v16, 0.0 }
 0x1d3   :  { %v312_v56 = vpop.f32.mrb[2].mxu1 }
 0x1d4   :  { %v313_v57 = vadd.f32 %v312_v56, %v245_v55  ;;  %v1184_v58 = vpop.f32.mrb[3].mxu1  ;;  %v843_v55 = vrot.slane %v1541_v44, %v413_v59 }
 0x1d6   :  { %v316_v60 = vmul.f32 0.17677669, %v313_v57 }
 0x1d8   :  { %v652_v61 = vrot.slane %v316_v60, 1  ;;  %1210 = vmatmul.mubr.msk.f32.vlgmr.msra.gmra.mrb[4].mxu0 %vm137_vm2, %v316_v60 }
 0x1d9   :  { %1214 = vmatprep.mubr.msk.f32.mxu0 %vm1380_vm0, %v1381_v1 }
 0x1da   :  { %1220 = vmatmul.mubr.msk.f32.vlgmr.msra.gmra.mrb[6].mxu1 %vm137_vm2, %v652_v61 }
 0x1db   :  { %v1206_v63 = vpop.f32.mrb[4].mxu1  ;;  %1235 = vmatprep.mubr.msk.f32.mxu1 %vm1380_vm0, %v1381_v1 }
 0x1dc   :  { %v487_v2 = vadd.f32 %v1206_v63, %v414_v62  ;;  %v481_v3 = vpop.f32.mrb[5].mxu1 }
 0x1dd   :  { %v482_v4 = vadd.f32 %v481_v3, %v414_v62 }
 0x1df   :  { %1213 = vmatpush3.msra.mxu0 %v482_v4 }
 0x1e0   :  { %1222 = vmatprep.subr.mxu0 %v1381_v1 }
 0x2ab   :  { %v562_v8 = vpop.f32.mrb[4].mxu0 }
 0x2ac   :  { %v1211_v10 = vpop.f32.mrb[5].mxu0  ;;  %v567_v11 = vsel %vm566_vm3, %v562_v8, -inf }
 0x2ad   :  { %v724_v12 = vpop.f32.mrb[6].mxu1  ;;  %568 = vmax.xlane.f32.xlu0 %v567_v11 }
 0x2ae   :  { %v1221_v14 = vpop.f32.mrb[7].mxu1  ;;  %v728_v15 = vsel %vm566_vm3, %v724_v12, -inf }
 0x2b1   :  { %729 = vmax.xlane.f32.xlu0 %v728_v15 }
 0x2b5   :  { %214 = vadd.xlane.f32.xlu0 %v213_v17 }
 0x33a   :  { %v569_v18 = vpop.xlane.xlu0 %568 }
 0x33b   :  { %v570_v19 = vsub.f32 %v562_v8, %v569_v18 }
 0x33d   :  { %v571_v20 = vmul.f32 1.442695, %v570_v19 }
 0x33e   :  { %v730_v21 = vpop.xlane.xlu0 %729 }
 0x33f   :  { %1308 = vpow2.f32 %v571_v20  ;;  %v731_v22 = vsub.f32 %v724_v12, %v730_v21  ;;  %v832_v12 = vsub.s32 5, %v1474_v27 }
 0x341   :  { %v732_v23 = vmul.f32 1.442695, %v731_v22  ;;  %v851_v18 = vrot.slane %v1541_v44, %v832_v12  ;;  %v1382_v22 = vmov 0  }
 0x342   :  { %v215_v25 = vpop.xlane.xlu0 %214  ;;  %1306 = vset.pattern.permute.xlu0 %v1382_v22  ;;  %1307 = vset.pattern.permute.xlu1 %v1382_v22 }
 0x343   :  { %1310 = vpow2.f32 %v732_v23  ;;  %v217_v26 = vmul.f32 0.03125, %v215_v25  ;;  %v882_v23 = vld [vmem:[#allocation2 + $0x80] sm:$0xff]  ;;  %v883_v25 = vld [vmem:[#allocation2 + $0x88] sm:$0xff] }
 0x345   :  { %v218_v24 = vsub.f32 %v211_v16, %v217_v26  ;;  %v838_v16 = vrot.slane %v1480_v29, %v837_v13  ;;  %v887_v26 = vld [vmem:[#allocation2 + $0xa0] sm:$0xff] }
 0x347   :  { %v219_v30 = vmul.f32 %v218_v24, %v218_v24 }
 0x349   :  { %v1309_v31 = vpop.eup %1308  ;;  %v220_v32 = vsel %vm212_vm5, %v219_v30, 0.0  ;;  %v888_v30 = vld [vmem:[#allocation2 + $0xa8] sm:$0xff] }
 0x34a   :  { %221 = vadd.xlane.f32.xlu0 %v220_v32  ;;  %v573_v33 = vsel %vm566_vm3, %v1309_v31, 0.0  ;;  %v885_v32 = vld [vmem:[#allocation2 + $0x98] sm:$0xff] }
 0x34b   :  { %574 = vadd.xlane.f32.xlu1 %v573_v33  ;;  %v1287_v33 = vpack.c.bf16 %v888_v30, %v887_v26 }
 0x34d   :  { %v1311_v34 = vpop.eup %1310  ;;  %1288 = vmatpush3.bf16.msra.mxu1 %v1287_v33 }
 0x34e   :  { %v734_v36 = vsel %vm566_vm3, %v1311_v34, 0.0  ;;  %1289 = vmatprep.subr.bf16.mxu1 %v1379_v0 }
 0x34f   :  { %735 = vadd.xlane.f32.xlu1 %v734_v36 }
 0x3d7   :  { %v222_v37 = vpop.xlane.xlu0 %221 }
 0x3d8   :  { %v223_v38 = vmul.f32 0.03125, %v222_v37  ;;  %v575_v39 = vpop.xlane.xlu1 %574 }
 0x3d9   :  { %1312 = vrcp.f32 %v575_v39 }
 0x3da   :  { %v224_v40 = vadd.f32 1e-05, %v223_v38 }
 0x3dc   :  { %1314 = vrsqrt.f32 %v224_v40  ;;  %v736_v41 = vpop.xlane.xlu1 %735 }
 0x3dd   :  { %1316 = vrcp.f32 %v736_v41 }
 0x3e3   :  { %v1313_v43 = vpop.eup %1312 }
 0x3e4   :  { %v577_v45 = vmul.f32 %v1313_v43, %v1309_v31  ;;  %v884_v31 = vld [vmem:[#allocation2 + $0x90] sm:$0xff] }
 0x3e6   :  { %v1315_v48 = vpop.eup %1314  ;;  %1215 = vmatmul.mubr.msk.f32.vlgmr.msra.gmra.mrb[6].mxu0 %vm578_vm6, %v577_v45 }
 0x3e7   :  { %v1317_v49 = vpop.eup %1316  ;;  %1223 = vmatpush3.msra.mxu0 %v487_v2  ;;  %1224 = vmatprep.mubr.msk.f32.mxu0 %vm1380_vm0, %v1381_v1  ;;  %v226_v50 = vmul.f32 %v1315_v48, %v218_v24  ;;  %v1293_v24 = vpack.c.bf16 %v883_v25, %v882_v23  ;;  %v890_v48 = vld [vmem:[#allocation2 + $0xb8] sm:$0xff] }
 0x3e8   :  { %v738_v52 = vmul.f32 %v1317_v49, %v1311_v34  ;;  %1292 = vmatprep.subr.bf16.mxu0 %v1379_v0  ;;  %v860_v34 = vrot.slane %v1541_v44, %v837_v13 }
 0x3e9   :  { %v231_v53 = vmul.f32 %v230_v47, %v226_v50  ;;  %v889_v47 = vld [vmem:[#allocation2 + $0xb0] sm:$0xff] }
 0x3ea   :  { %1225 = vmatmul.mubr.msk.f32.vlgmr.msra.gmra.mrb[8].mxu0 %vm578_vm6, %v738_v52  ;;  %v1290_v50 = vpack.c.bf16 %v890_v48, %v889_v47 }
 0x3eb   :  { %v1553_v56 = vadd.f32 %v235_v51, %v231_v53  ;;  %1246 = vmatprep.mubr.msk.f32.mxu0 %vm1380_vm0, %v1381_v1  ;;  %1294 = vmatpush3.bf16.msra.mxu0 %v1293_v24 }
 0x3ec   :  { %1295 = vmatprep.subr.bf16.mxu0 %v1379_v0  ;;  %1291 = vmatpush3.bf16.msra.mxu1 %v1290_v50 }
 0x3ed   :  { %v844_v57 = vmul.f32 %v843_v55, %v1553_v56 }
 0x3ef   :  { %v845_v58 = vsel %vm212_vm5, %v844_v57, 0.0 }
 0x3f0   :  { %846 = vadd.xlane.f32.xlu0 %v845_v58  ;;  %v1040_v58 = vrot.slane %v1541_v44, %v135_v5  ;;  %v1058_v5 = vrot.slane %v1541_v44, %v244_v54 }
 0x47d   :  { %v847_v36 = vpop.xlane.xlu0 %846 }
 0x4b9   :  { %v648_v28 = vpop.f32.mrb[6].mxu0 }
 0x4ba   :  { %v1216_v60 = vpop.f32.mrb[7].mxu0 }
 0x4bd   :  { %v808_v61 = vpop.f32.mrb[8].mxu0 }
 0x4be   :  { %v813_v62 = vrot.slane %v808_v61, 7  ;;  %v1226_v63 = vpop.f32.mrb[9].mxu0 }
 0x4c0   :  { %v815_v2 = vsel %vm43_vm4, %v648_v28, %v813_v62 }
 0x4c1   :  { %v816_v59 = vadd.f32 %v815_v2, %v1485_v35  ;;  %v833_v35 = vrot.slane %v1480_v29, %v832_v12  ;;  %v1296_v29 = vpack.c.bf16 %v885_v32, %v884_v31 }
 0x4c3   :  { %v817_v3 = vsel %vm212_vm5, %v816_v59, 0.0  ;;  %1297 = vmatpush3.bf16.msra.mxu0 %v1296_v29 }
 0x4c4   :  { %818 = vadd.xlane.f32.xlu1 %v817_v3 }
 0x551   :  { %v819_v4 = vpop.xlane.xlu1 %818 }
 0x552   :  { %v820_v6 = vmul.f32 0.03125, %v819_v4 }
 0x554   :  { %v821_v1 = vsub.f32 %v816_v59, %v820_v6 }
 0x556   :  { %v822_v7 = vmul.f32 %v821_v1, %v821_v1 }
 0x558   :  { %v823_v8 = vsel %vm212_vm5, %v822_v7, 0.0 }
 0x559   :  { %824 = vadd.xlane.f32.xlu1 %v823_v8 }
 0x5e6   :  { %v825_v9 = vpop.xlane.xlu1 %824 }
 0x5e7   :  { %v826_v10 = vmul.f32 0.03125, %v825_v9  ;;  %v1063_v9 = vrot.slane %v1541_v44, %v324_v46 }
 0x5e9   :  { %v827_v11 = vadd.f32 1e-05, %v826_v10 }
 0x5eb   :  { %1318 = vrsqrt.f32 %v827_v11 }
 0x5f5   :  { %v1319_v14 = vpop.eup %1318 }
 0x5f6   :  { %v829_v15 = vmul.f32 %v1319_v14, %v821_v1 }
 0x5f8   :  { %v834_v17 = vmul.f32 %v833_v35, %v829_v15 }
 0x5fa   :  { %v839_v19 = vadd.f32 %v838_v16, %v834_v17 }
 0x5fc   :  { %v852_v20 = vmul.f32 %v851_v18, %v839_v19 }
 0x5fe   :  { %v853_v21 = vsel %vm212_vm5, %v852_v20, 0.0 }
 0x5ff   :  { %854 = vadd.xlane.f32.xlu1 %v853_v21 }
 0x68c   :  { %v855_v37 = vpop.xlane.xlu1 %854 }
 0x68d   :  { %v856_v38 = vadd.f32 %v855_v37, %v847_v36 }
 0x68f   :  { %v861_v39 = vadd.f32 %v860_v34, %v856_v38 }
 0x691   :  { %v862_v40 = vsub.f32 0.0, %v861_v39 }
 0x693   :  { %v863_v41 = vmul.f32 1.442695, %v862_v40 }
 0x695   :  { %1320 = vpow2.f32 %v863_v41 }
 0x69f   :  { %v1321_v42 = vpop.eup %1320 }
 0x6a0   :  { %v865_v43 = vadd.f32 1.0, %v1321_v42 }
 0x6a2   :  { %1322 = vrcp.f32 %v865_v43 }
 0x6ac   :  { %v1323_v45 = vpop.eup %1322 }
 0x6ad   :  { %871 = vperm.xlu0 %1306, %v1323_v45   ;;  %v868_v49 = vsub.f32 1.0, %v1323_v45 }
 0x6af   :  { %877 = vperm.xlu1 %1307, %v868_v49  }
 0x72c   :  { %v872_v0 = vpop.permute.xlu0 %871 }
 0x72d   :  { %v874_v51 = vmul.f32 %v872_v0, %v1553_v56 }
 0x72e   :  { %v878_v52 = vpop.permute.xlu1 %877 }
 0x72f   :  { %v880_v53 = vmul.f32 %v878_v52, %v839_v19  ;;  %1247 = vmatmul.mubr.msk.f32.vlgmr.msra.gmra.mrb[10].mxu0 %vm137_vm2, %v874_v51 }
 0x731   :  { %1236 = vmatmul.mubr.msk.f32.vlgmr.msra.gmra.mrb[8].mxu1 %vm137_vm2, %v880_v53 }
 0x802   :  { %v1033_v55 = vpop.f32.mrb[10].mxu0 }
 0x803   :  { %v1248_v57 = vpop.f32.mrb[11].mxu0 }
 0x804   :  { %v960_v28 = vpop.f32.mrb[8].mxu1 }
 0x805   :  { %v1034_v60 = vadd.f32 %v1033_v55, %v960_v28  ;;  %v1237_v61 = vpop.f32.mrb[9].mxu1 }
 0x807   :  { %v1041_v62 = vadd.f32 %v1040_v58, %v1034_v60 }
 0x809   :  { %v1042_v63 = vsel %vm212_vm5, %v1041_v62, 0.0 }
 0x80a   :  { %1043 = vadd.xlane.f32.xlu1 %v1042_v63 }
 0x897   :  { %v1044_v56 = vpop.xlane.xlu1 %1043 }
 0x898   :  { %v1045_v2 = vmul.f32 0.03125, %v1044_v56 }
 0x89a   :  { %v1046_v59 = vsub.f32 %v1041_v62, %v1045_v2 }
 0x89c   :  { %v1047_v3 = vmul.f32 %v1046_v59, %v1046_v59 }
 0x89e   :  { %v1048_v4 = vsel %vm212_vm5, %v1047_v3, 0.0 }
 0x89f   :  { %1049 = vadd.xlane.f32.xlu0 %v1048_v4 }
 0x92c   :  { %v1050_v6 = vpop.xlane.xlu0 %1049 }
 0x92d   :  { %v1051_v1 = vmul.f32 0.03125, %v1050_v6 }
 0x92f   :  { %v1052_v7 = vadd.f32 1e-05, %v1051_v1 }
 0x931   :  { %1324 = vrsqrt.f32 %v1052_v7 }
 0x93b   :  { %v1325_v8 = vpop.eup %1324 }
 0x93c   :  { %v1054_v10 = vmul.f32 %v1325_v8, %v1046_v59 }
 0x93e   :  { %v1059_v11 = vmul.f32 %v1058_v5, %v1054_v10 }
 0x940   :  { %v1064_v12 = vadd.f32 %v1063_v9, %v1059_v11 }
 0x942   :  { %v1066_v13 = vmul.f32 0.70710677, %v1064_v12  ;;  %v1065_v14 = vmul.f32 0.5, %v1064_v12 }
 0x944   :  { %1326 = verf.f32 %v1066_v13 }
 0x94e   :  { %v1327_v35 = vpop.eup %1326 }
 0x94f   :  { %v1068_v15 = vadd.f32 1.0, %v1327_v35 }
 0x951   :  { %v1069_v16 = vmul.f32 %v1068_v15, %v1065_v14 }
 0x953   :  { %1070 = vst.msk [vmem:[#allocation5] sm:$0x3] %vm212_vm5, %v1069_v16 }
 0x954   :  { %1361 = shalt.err (!%p1358_p12)
}
 0x955   :  { %s1362_s29 = scalar_lea.hbm %s1604_s5, 32 }
 0x956   :  { %p1363_p13 = scmp.ne.s32.totalorder %s1604_s5, %s1362_s29  ;;  %p1366_p0 = scmp.lt.u32.totalorder %s1362_s29, %s1604_s5 }
 0x958   :  { %p1368_p1 = pnand %p1366_p0, %p1363_p13 }
 0x95a   :  { %1371 = shalt.err (!%p1368_p1)
}
 0x95b   :  { %1080 = dma.vmem_to_hbm [thread:$0]  %s1078_s25, 32, %s1604_s5, [#allocation4]  }
 0x95c   :  { %1374 = dma.done.wait [#allocation4], 32  }
 0x95d   :  { %1375 = vsyncadd [#allocation4], 4294967264 }
 0x95e   :  { %1084 = vsyncpa [#allocation3], 1 }
 0x95f   :  { %1085 = vsyncpa [#allocation4], 1 }

</bundles_post_ra>
